<compile_context>
chip_gen: v5e
topology: v5e:2x2
jax: 0.10.0
libtpu: 0.0.40
codegen_flags: <defaults>
</compile_context>

<pallas_src>
import functools

import jax
import jax.numpy as jnp
from jax.experimental import pallas as pl
from jax.experimental.pallas import tpu as pltpu

_LANE = 128
_NEG_BIG = -1.0e30  # used to zero-out padded softmax lanes without inf-inf risk


def _round_up(n: int, m: int) -> int:
    return ((n + m - 1) // m) * m


def _mlp_kernel(x_ref, w1_ref, b1_ref, w2_ref, b2_ref, w3_ref, b3_ref, o_ref,
                *, use_softmax: bool, out_valid: int):
    # l1 + relu (bf16 matmul, f32 accumulate; bias add fused with the max)
    h1 = jnp.dot(x_ref[...], w1_ref[...], preferred_element_type=jnp.float32)
    h1 = jnp.maximum(h1 + b1_ref[...], 0.0).astype(w2_ref.dtype)
    # l2 + relu
    h2 = jnp.dot(h1, w2_ref[...], preferred_element_type=jnp.float32)
    h2 = jnp.maximum(h2 + b2_ref[...], 0.0).astype(w3_ref.dtype)
    # l3
    out = jnp.dot(h2, w3_ref[...], preferred_element_type=jnp.float32)
    out = out + b3_ref[...]
    if use_softmax:
        # F.softmax on 2-D input == softmax over the last dim.  Mask padded
        # feature lanes so they contribute exp(~-inf) = 0 to the denominator.
        if out_valid < out.shape[-1]:
            lane = jax.lax.broadcasted_iota(jnp.int32, out.shape, out.ndim - 1)
            out = jnp.where(lane < out_valid, out, _NEG_BIG)
        m = jnp.max(out, axis=-1, keepdims=True)
        e = jnp.exp(out - m)
        out = e / jnp.sum(e, axis=-1, keepdims=True)  # exact, matches F.softmax
    o_ref[...] = out.astype(o_ref.dtype)


def _choose_tile_b(batch: int, requested: int) -> int:
    """Largest multiple-of-8 batch tile <= requested, preferring >=2 grid steps
    (so v7x's 2 TensorCores both get work) when the batch allows it."""
    b8 = _round_up(batch, 8)
    tile = min(requested, b8)
    if b8 >= 16:
        half = _round_up(pl.cdiv(b8, 2), 8)
        tile = min(tile, max(half, 8))
    return max(tile, 8)


def mlp_forward(x, params, *, use_softmax=False, tile_b=512,
                compute_dtype=jnp.bfloat16):
    """Fused 3-layer MLP forward (matches the PyTorch Model.forward)."""
    w1, b1, w2, b2, w3, b3 = params
    orig_dtype = x.dtype
    lead_shape = x.shape[:-1]
    in_dim = x.shape[-1]
    x2 = x.reshape(-1, in_dim)
    batch = x2.shape[0]

    hidden = w1.shape[1]
    mid = w2.shape[1]
    out_dim = w3.shape[1]

    # Lane-dense feature padding (zero padding is exact for the matmuls).
    in_pad = _round_up(in_dim, _LANE)
    out_pad = _round_up(out_dim, _LANE)

    # Batch tile / grid.
    tb = _choose_tile_b(batch, tile_b)
    b_pad = _round_up(batch, tb)
    grid = (b_pad // tb,)

    cd = jnp.dtype(compute_dtype)
    f32 = jnp.float32

    # Pad + cast inputs and weights at the wrapper boundary (bf16 halves DMA
    # bytes and VMEM; f32 accumulation inside the kernel preserves accuracy).
    xp = jnp.zeros((b_pad, in_pad), cd).at[:batch, :in_dim].set(x2.astype(cd))
    w1p = jnp.zeros((in_pad, hidden), cd).at[:in_dim, :].set(w1.astype(cd))
    w2c = w2.astype(cd)
    w3p = jnp.zeros((mid, out_pad), cd).at[:, :out_dim].set(w3.astype(cd))
    b1c = b1.astype(f32)
    b2c = b2.astype(f32)
    b3p = jnp.zeros((1, out_pad), f32).at[:, :out_dim].set(b3.astype(f32))

    kernel = functools.partial(_mlp_kernel, use_softmax=use_softmax,
                               out_valid=out_dim)

    in_bytes = (xp.size + w1p.size + w2c.size + w3p.size) * cd.itemsize \
        + (b1c.size + b2c.size + b3p.size) * 4
    out_bytes = b_pad * out_pad * jnp.dtype(orig_dtype).itemsize
    cost = pl.CostEstimate(
        flops=2 * b_pad * (in_pad * hidden + hidden * mid + mid * out_pad),
        transcendentals=(b_pad * out_pad) if use_softmax else 0,
        bytes_accessed=in_bytes + out_bytes,
    )

    out_padded = pl.pallas_call(
        kernel,
        out_shape=jax.ShapeDtypeStruct((b_pad, out_pad), orig_dtype),
        grid_spec=pltpu.PrefetchScalarGridSpec(
            num_scalar_prefetch=0,
            grid=grid,
            in_specs=[
                pl.BlockSpec((tb, in_pad), lambda i: (i, 0)),     # x tile
                pl.BlockSpec((in_pad, hidden), lambda i: (0, 0)),  # w1 (invariant)
                pl.BlockSpec((1, hidden), lambda i: (0, 0)),       # b1
                pl.BlockSpec((hidden, mid), lambda i: (0, 0)),     # w2 (invariant)
                pl.BlockSpec((1, mid), lambda i: (0, 0)),          # b2
                pl.BlockSpec((mid, out_pad), lambda i: (0, 0)),    # w3 (invariant)
                pl.BlockSpec((1, out_pad), lambda i: (0, 0)),      # b3
            ],
            out_specs=pl.BlockSpec((tb, out_pad), lambda i: (i, 0)),
        ),
        compiler_params=pltpu.CompilerParams(
            dimension_semantics=("parallel",)),
        cost_estimate=cost,
    )(xp, w1p, b1c, w2c, b2c, w3p, b3p)

    return out_padded[:batch, :out_dim].reshape(*lead_shape, out_dim)


def init_params(key, in_dim, hidden_dim, out_dim, dtype=jnp.float32):
    """Deterministic init mimicking nn.Linear's uniform(-1/sqrt(fan_in), +)."""
    ks = jax.random.split(key, 6)

    def linear(kw, kb, fan_in, fan_out):
        bound = 1.0 / jnp.sqrt(fan_in)
        # stored as [in, out] (transposed vs PyTorch's [out, in])
        w = jax.random.uniform(kw, (fan_in, fan_out), dtype, -bound, bound)
        b = jax.random.uniform(kb, (1, fan_out), dtype, -bound, bound)
        return w, b

    w1, b1 = linear(ks[0], ks[1], in_dim, hidden_dim)
    w2, b2 = linear(ks[2], ks[3], hidden_dim, 64)
    w3, b3 = linear(ks[4], ks[5], 64, out_dim)
    return (w1, b1, w2, b2, w3, b3)


def reference_forward(x, params, use_softmax=False, compute_dtype=jnp.bfloat16):
    """Pure-JAX reference with the same bf16-matmul / f32-accumulate numerics."""
    w1, b1, w2, b2, w3, b3 = params
    cd = compute_dtype
    h1 = jnp.maximum(
        jnp.dot(x.astype(cd), w1.astype(cd),
                preferred_element_type=jnp.float32) + b1, 0.0)
    h2 = jnp.maximum(
        jnp.dot(h1.astype(cd), w2.astype(cd),
                preferred_element_type=jnp.float32) + b2, 0.0)
    out = jnp.dot(h2.astype(cd), w3.astype(cd),
                  preferred_element_type=jnp.float32) + b3
    if use_softmax:
        out = jax.nn.softmax(out, axis=-1)
    return out.astype(x.dtype)


if __name__ == "__main__":
    key = jax.random.PRNGKey(0)
    k_params, k_x = jax.random.split(key)

    # Small shapes consistent with the module (in_dim=4, hidden=128, 64, out=4).
    batch, in_dim, hidden_dim, out_dim = 24, 4, 128, 4
    params = init_params(k_params, in_dim, hidden_dim, out_dim)
    x = jax.random.normal(k_x, (batch, in_dim), dtype=jnp.float32)

    # softmax=False branch
    y = jax.block_until_ready(mlp_forward(x, params, use_softmax=False))
    y_ref = reference_forward(x, params, use_softmax=False)
    assert y.shape == (batch, out_dim)
    assert jnp.allclose(y, y_ref, atol=2e-2, rtol=2e-2), "mismatch vs reference"

    # softmax=True branch
    ys = jax.block_until_ready(mlp_forward(x, params, use_softmax=True))
    ys_ref = reference_forward(x, params, use_softmax=True)
    assert jnp.allclose(ys, ys_ref, atol=2e-2, rtol=2e-2), "softmax mismatch"
    assert jnp.allclose(jnp.sum(ys, axis=-1), 1.0, atol=1e-3), "rows must sum to 1"

    print("KERNEL_OK")
</pallas_src>

<mosaic_0001>
module attributes {stable_mosaic.version = 11 : i64} {
  func.func @_mlp_kernel(%arg0: i32, %arg1: memref<16x128xbf16, #tpu.memory_space<vmem>>, %arg2: memref<128x128xbf16, #tpu.memory_space<vmem>>, %arg3: memref<1x128xf32, #tpu.memory_space<vmem>>, %arg4: memref<128x64xbf16, #tpu.memory_space<vmem>>, %arg5: memref<1x64xf32, #tpu.memory_space<vmem>>, %arg6: memref<64x128xbf16, #tpu.memory_space<vmem>>, %arg7: memref<1x128xf32, #tpu.memory_space<vmem>>, %arg8: memref<16x128xf32, #tpu.memory_space<vmem>>) attributes {dimension_semantics = [#tpu.dimension_semantics<parallel>], iteration_bounds = array<i64: 2>, scalar_prefetch = 0 : i64, scratch_operands = 0 : i64, tpu.core_type = #tpu.core_type<tc>, window_params = [{transform_indices = @transform_0, window_bounds = array<i64: 16, 128>}, {pipeline_mode = #tpu.pipeline_mode<synchronous>, transform_indices = @transform_1, window_bounds = array<i64: 128, 128>}, {pipeline_mode = #tpu.pipeline_mode<synchronous>, transform_indices = @transform_2, window_bounds = array<i64: 1, 128>}, {pipeline_mode = #tpu.pipeline_mode<synchronous>, transform_indices = @transform_3, window_bounds = array<i64: 128, 64>}, {pipeline_mode = #tpu.pipeline_mode<synchronous>, transform_indices = @transform_4, window_bounds = array<i64: 1, 64>}, {pipeline_mode = #tpu.pipeline_mode<synchronous>, transform_indices = @transform_5, window_bounds = array<i64: 64, 128>}, {pipeline_mode = #tpu.pipeline_mode<synchronous>, transform_indices = @transform_6, window_bounds = array<i64: 1, 128>}, {transform_indices = @transform_7, window_bounds = array<i64: 16, 128>}]} {
    %c0 = arith.constant 0 : index
    %c0_0 = arith.constant 0 : index
    %0 = vector.load %arg1[%c0, %c0_0] : memref<16x128xbf16, #tpu.memory_space<vmem>>, vector<16x128xbf16>
    %c0_1 = arith.constant 0 : index
    %c0_2 = arith.constant 0 : index
    %1 = vector.load %arg2[%c0_1, %c0_2] : memref<128x128xbf16, #tpu.memory_space<vmem>>, vector<128x128xbf16>
    %cst = arith.constant dense<0.000000e+00> : vector<16x128xf32>
    %2 = tpu.matmul %0, %1, %cst {dimension_numbers = #tpu.dot_dimension_numbers<[1], [0], [0], [1], [0, 0, 1, 1], [], []>} : vector<16x128xbf16>, vector<128x128xbf16>, vector<16x128xf32> -> vector<16x128xf32>
    %c0_3 = arith.constant 0 : index
    %c0_4 = arith.constant 0 : index
    %3 = vector.load %arg3[%c0_3, %c0_4] : memref<1x128xf32, #tpu.memory_space<vmem>>, vector<1x128xf32>
    %4 = vector.broadcast %3 : vector<1x128xf32> to vector<16x128xf32>
    %5 = arith.addf %2, %4 : vector<16x128xf32>
    %cst_5 = arith.constant 0.000000e+00 : f32
    %6 = vector.broadcast %cst_5 : f32 to vector<16x128xf32>
    %7 = arith.maximumf %5, %6 : vector<16x128xf32>
    %8 = arith.truncf %7 : vector<16x128xf32> to vector<16x128xbf16>
    %c0_6 = arith.constant 0 : index
    %c0_7 = arith.constant 0 : index
    %9 = vector.load %arg4[%c0_6, %c0_7] : memref<128x64xbf16, #tpu.memory_space<vmem>>, vector<128x64xbf16>
    %cst_8 = arith.constant dense<0.000000e+00> : vector<16x64xf32>
    %10 = tpu.matmul %8, %9, %cst_8 {dimension_numbers = #tpu.dot_dimension_numbers<[1], [0], [0], [1], [0, 0, 1, 1], [], []>} : vector<16x128xbf16>, vector<128x64xbf16>, vector<16x64xf32> -> vector<16x64xf32>
    %c0_9 = arith.constant 0 : index
    %c0_10 = arith.constant 0 : index
    %11 = vector.load %arg5[%c0_9, %c0_10] : memref<1x64xf32, #tpu.memory_space<vmem>>, vector<1x64xf32>
    %12 = vector.broadcast %11 : vector<1x64xf32> to vector<16x64xf32>
    %13 = arith.addf %10, %12 : vector<16x64xf32>
    %cst_11 = arith.constant 0.000000e+00 : f32
    %14 = vector.broadcast %cst_11 : f32 to vector<16x64xf32>
    %15 = arith.maximumf %13, %14 : vector<16x64xf32>
    %16 = arith.truncf %15 : vector<16x64xf32> to vector<16x64xbf16>
    %c0_12 = arith.constant 0 : index
    %c0_13 = arith.constant 0 : index
    %17 = vector.load %arg6[%c0_12, %c0_13] : memref<64x128xbf16, #tpu.memory_space<vmem>>, vector<64x128xbf16>
    %cst_14 = arith.constant dense<0.000000e+00> : vector<16x128xf32>
    %18 = tpu.matmul %16, %17, %cst_14 {dimension_numbers = #tpu.dot_dimension_numbers<[1], [0], [0], [1], [0, 0, 1, 1], [], []>} : vector<16x64xbf16>, vector<64x128xbf16>, vector<16x128xf32> -> vector<16x128xf32>
    %c0_15 = arith.constant 0 : index
    %c0_16 = arith.constant 0 : index
    %19 = vector.load %arg7[%c0_15, %c0_16] : memref<1x128xf32, #tpu.memory_space<vmem>>, vector<1x128xf32>
    %20 = vector.broadcast %19 : vector<1x128xf32> to vector<16x128xf32>
    %21 = arith.addf %18, %20 : vector<16x128xf32>
    %c0_17 = arith.constant 0 : index
    %c0_18 = arith.constant 0 : index
    %22 = vector.load %arg8[%c0_17, %c0_18] : memref<16x128xf32, #tpu.memory_space<vmem>>, vector<16x128xf32>
    tpu.vector_store %arg8[%c0_17, %c0_18], %21 {strides = array<i32>} : memref<16x128xf32, #tpu.memory_space<vmem>>, vector<16x128xf32>,
    return
  }
  func.func @transform_0(%arg0: i32) -> (i32, i32) {
    %c0_i32 = arith.constant 0 : i32
    %c0_i32_0 = arith.constant 0 : i32
    return %arg0, %c0_i32 : i32, i32
  }
  func.func @transform_1(%arg0: i32) -> (i32, i32) {
    %c0_i32 = arith.constant 0 : i32
    %c0_i32_0 = arith.constant 0 : i32
    %c0_i32_1 = arith.constant 0 : i32
    return %c0_i32, %c0_i32_0 : i32, i32
  }
  func.func @transform_2(%arg0: i32) -> (i32, i32) {
    %c0_i32 = arith.constant 0 : i32
    %c0_i32_0 = arith.constant 0 : i32
    %c0_i32_1 = arith.constant 0 : i32
    return %c0_i32, %c0_i32_0 : i32, i32
  }
  func.func @transform_3(%arg0: i32) -> (i32, i32) {
    %c0_i32 = arith.constant 0 : i32
    %c0_i32_0 = arith.constant 0 : i32
    %c0_i32_1 = arith.constant 0 : i32
    return %c0_i32, %c0_i32_0 : i32, i32
  }
  func.func @transform_4(%arg0: i32) -> (i32, i32) {
    %c0_i32 = arith.constant 0 : i32
    %c0_i32_0 = arith.constant 0 : i32
    %c0_i32_1 = arith.constant 0 : i32
    return %c0_i32, %c0_i32_0 : i32, i32
  }
  func.func @transform_5(%arg0: i32) -> (i32, i32) {
    %c0_i32 = arith.constant 0 : i32
    %c0_i32_0 = arith.constant 0 : i32
    %c0_i32_1 = arith.constant 0 : i32
    return %c0_i32, %c0_i32_0 : i32, i32
  }
  func.func @transform_6(%arg0: i32) -> (i32, i32) {
    %c0_i32 = arith.constant 0 : i32
    %c0_i32_0 = arith.constant 0 : i32
    %c0_i32_1 = arith.constant 0 : i32
    return %c0_i32, %c0_i32_0 : i32, i32
  }
  func.func @transform_7(%arg0: i32) -> (i32, i32) {
    %c0_i32 = arith.constant 0 : i32
    %c0_i32_0 = arith.constant 0 : i32
    return %arg0, %c0_i32 : i32, i32
  }
}

</mosaic_0001>

<bundles_post_ra>
// kernel: tpu_custom_call.1
= control target key start
LH: loop header
LB: loop body
LE: loop exit
PB: predicated region body
PF: predicated region fallthrough
CT: control target
= control target key end

     0   :  { %12 = vsyncpa [#allocation3], 0  ;;  %s1139_s0 = inlined_call_operand.hbm [shape: bf16[32,128], index: 0, kind: input, shape index: {}]   ;;  %s1140_s1 = inlined_call_operand.vmem [shape: bf16[128,128], index: 1, kind: input, shape index: {}]   ;;  %s1141_s2 = inlined_call_operand.vmem [shape: f32[1,128], index: 2, kind: input, shape index: {}]   ;;  %s1142_s3 = inlined_call_operand.vmem [shape: bf16[128,64], index: 3, kind: input, shape index: {}]   ;;  %s1143_s4 = inlined_call_operand.vmem [shape: f32[1,64], index: 4, kind: input, shape index: {}]   ;;  %s1144_s5 = inlined_call_operand.vmem [shape: bf16[64,128], index: 5, kind: input, shape index: {}]   ;;  %s1145_s6 = inlined_call_operand.vmem [shape: f32[1,128], index: 6, kind: input, shape index: {}]   ;;  %s1146_s7 = inlined_call_operand.hbm [shape: f32[32,128], index: 7, kind: output, shape index: {}]  }
   0x1   :  { %14 = vsyncpa [#allocation3 + $0x1], 0 }
   0x2   :  { %15 = vsyncpa [#allocation4], 0 }
   0x3   :  { %17 = vsyncpa [#allocation4 + $0x1], 0  ;;  %s942_s24 = smov 0   ;;  %s944_s25 = smov 0  }
   0x4   :  { %s946_s26 = smov 0   ;;  %s948_s27 = smov 0  }
   0x5 LB: > { %s963_s28 = sadd.s32 4294967295, %s896_s27   ;;  %s625_s29 = sadd.s32 4294967294, %s896_s27   ;;  %s896_s27 = sphi %s948_s27, %s1158_s27   ;;  %s892_s26 = sphi %s946_s26, %s1157_s26   ;;  %s888_s25 = sphi %s944_s25, %s1156_s25   ;;  %s884_s24 = sphi %s942_s24, %s1155_s24  }
   0x6   : > { %s967_s30 = sadd.s32 1, %s896_s27   ;;  %s30_s8 = sadd.s32 1, %s892_s26 }
   0x7   : > { %s27_s9 = ssub.s32 %s896_s27, %s967_s30  ;;  %p37_p0 = scmp.ne.s32.totalorder %s892_s26, %s888_s25 }
   0x8   : > { %p28_p1 = scmp.eq.s32.totalorder %s27_s9, 0  ;;  %p38_p2 = scmp.eq.s32.totalorder %s896_s27, 0 }
   0x9   : > { %p43_p3 = scmp.ne.s32.totalorder %s888_s25, %s884_s24  ;;  %p44_p4 = scmp.eq.s32.totalorder %s963_s28, 0 }
   0xa   : > { %s979_s10 = scalar_select %p28_p1, %s892_s26, %s30_s8  }
   0xb   : > { %p981_p5 = por %p38_p2, %p37_p0  ;;  %p985_p6 = por %p44_p4, %p43_p3 }
   0xc   : > { %1147 = sst [smem:[#allocation8_spill]] %s979_s10  ;;  %p193_p7 = scmp.eq.s32.totalorder %s963_s28, 1 }
   0xd   : > { %p199_p8 = scmp.eq.s32.totalorder %s625_s29, 1  ;;  %p759_p10 = scmp.lt.s32.totalorder %s896_s27, 2 }
   0xe   : > { %p992_p11 = por %p193_p7, %p37_p0  ;;  %s237_s15 = sand.u32 1, %s892_s26  }
   0xf   : > { %p996_p12 = por %p199_p8, %p43_p3  ;;  %s724_s16 = sshll.u32 %s896_s27, 3 }
  0x10   : > { %s628_s17 = sshll.u32 %s237_s15, 3  ;;  %s246_s20 = scalar_lea.hbm %s1139_s0, %s724_s16 }
  0x11   : > { %s247_s21 = sshll.u32 %s246_s20, 4  ;;  %s241_s22 = scalar_lea.vmem [#allocation2], %s628_s17  ;;  %s248_s21 = int_to_ptr.hbm [resolvable:$true] %s247_s21 }
  0x12   : > { %s249_s23 = sshll.u32 %s241_s22, 4  ;;  %p1007_p13 = pnand %p759_p10, %p981_p5  ;;  %s250_s23 = int_to_ptr.vmem [resolvable:$true] %s249_s23 }
  0x13   : > { %p631_p0 = scmp.ge.s32.totalorder %s896_s27, 1  ;;  %p257_p1 = scmp.lt.s32.totalorder %s896_s27, 3 }
  0x14   : > { %s238_s8 = scalar_lea.sflag [#allocation3], %s237_s15  ;;  %s800_s9 = sshra.s32 %s248_s21, 4  ;;  %s801_s9 = int_to_ptr.hbm [resolvable:$true] %s800_s9 }
  0x15   : > { %s802_s10 = scalar_lea.hbm %s801_s9, 8  ;;  %p804_p3 = pneg %p1007_p13 }
  0x16   : > { %p803_p2 = scmp.ne.s32.totalorder %s801_s9, %s802_s10  ;;  %s807_s11 = scalar_lea.hbm %s1139_s0, 16 }
  0x17   : > { %p808_p5 = scmp.lt.s32.totalorder %s801_s9, %s1139_s0  ;;  %p809_p8 = scmp.lt.s32.totalorder %s807_s11, %s802_s10 }
  0x18   : > { %p805_p4 = pnand %p804_p3, %p803_p2 }
  0x19   : > { %p810_p10 = por %p809_p8, %p808_p5 }
  0x1a   : > { %p806_p7 = pneg %p805_p4 }
  0x1c   : > { %p811_p9 = pnand %p810_p10, %p806_p7 }
  0x1e   : > { %814 = shalt.err (!%p811_p9)
}
  0x1f   : > { %s898_s15 = smov 64   ;;  %s899_s20 = smov 4  }
  0x20   : > { %754 = dma.hbm_to_vmem [thread:$0]  (!%p1007_p13), %s248_s21, 128, %s250_s23, %s238_s8, %s898_s15, %s898_s15, %s899_s20  }
  0x21   : > { %p258_p2 = pnand %p631_p0, %p257_p1 }
  0x22   : > { %s1028_s22 = sand.u32 (!%p258_p2), 1, %s888_s25  }
  0x23   : > { %261 = sbr.rel (%p258_p2) target bundleno = 499 (0x1f3), region = 48  ;;  %s632_s10 = sshll.u32 (!%p258_p2), %s1028_s22, 3 }
  0x24   : > { %s264_s9 = scalar_lea.sflag (!%p258_p2), [#allocation3], %s1028_s22  ;;  %s267_s16 = scalar_lea.vmem (!%p258_p2), [#allocation2], %s632_s10 }
  0x28   : > { %875 = dma.done.wait (%p985_p6), %s264_s9, 128  }
  0x29   : > { %877 = vsyncadd (%p985_p6), %s264_s9, 4294967168  ;;  %v733_v0 = vld [vmem:[%s1140_s1 + $0x38] sm:$0xff]  ;;  %v732_v1 = vld [vmem:[%s1140_s1 + $0x30] sm:$0xff]  ;;  %vm516_vm0 = vcmask 523264   ;;  %s633_s17 = sshll.u32 %s1028_s22, 4  ;;  %s746_s18 = sshll.u32 %s963_s28, 4 }
  0x2a   : > { %378 = vmatpush.bf16.msra.mxu0 %v733_v0  ;;  %v741_v2 = vld [vmem:[%s1142_s3 + $0x38] sm:$0xff]  ;;  %v740_v3 = vld [vmem:[%s1142_s3 + $0x30] sm:$0xff]  ;;  %v731_v4 = vld [vmem:[%s1140_s1 + $0x28] sm:$0xff]  ;;  %s548_s15 = scalar_lea.hbm %s1146_s7, %s746_s18  ;;  %s298_s20 = scalar_lea.vmem [#allocation5], %s633_s17 }
  0x2b   : > { %463 = vmatpush.bf16.msra.mxu1 %v741_v2  ;;  %v739_v5 = vld [vmem:[%s1142_s3 + $0x28] sm:$0xff]  ;;  %v730_v6 = vld [vmem:[%s1140_s1 + $0x20] sm:$0xff]  ;;  %v729_v8 = vld [vmem:[%s1140_s1 + $0x18] sm:$0xff]  ;;  %s549_s10 = sshll.u32 %s298_s20, 4  ;;  %s551_s9 = sshll.u32 %s548_s15, 4  ;;  %s550_s10 = int_to_ptr.vmem [resolvable:$true] %s549_s10  ;;  %s552_s9 = int_to_ptr.hbm [resolvable:$true] %s551_s9 }
  0x2c   : > { %v738_v7 = vld [vmem:[%s1142_s3 + $0x20] sm:$0xff]  ;;  %v728_v9 = vld [vmem:[%s1140_s1 + $0x10] sm:$0xff]  ;;  %v727_v10 = vld [vmem:[%s1140_s1 + $0x8] sm:$0xff]  ;;  %s537_s29 = scalar_lea.sflag [#allocation4], %s1028_s22  ;;  %s844_s21 = sshra.s32 %s552_s9, 4  ;;  %s845_s21 = int_to_ptr.hbm [resolvable:$true] %s844_s21 }
  0x2d   : > { %v726_v11 = vld [vmem:[%s1140_s1] sm:$0xff]  ;;  %v737_v13 = vld [vmem:[%s1142_s3 + $0x18] sm:$0xff]  ;;  %v736_v14 = vld [vmem:[%s1142_s3 + $0x10] sm:$0xff]  ;;  %s846_s28 = scalar_lea.hbm %s845_s21, 16  ;;  %s850_s17 = scalar_lea.hbm %s1146_s7, 32 }
  0x2e   : > { %379 = vmatpush.bf16.msra.mxu0 %v732_v1  ;;  %v725_v12 = vld [vmem:[%s267_s16] sm:$0xff]  ;;  %v745_v25 = vld [vmem:[%s1144_s5 + $0x18] sm:$0xff]  ;;  %v744_v26 = vld [vmem:[%s1144_s5 + $0x10] sm:$0xff]  ;;  %p847_p6 = scmp.ne.s32.totalorder %s845_s21, %s846_s28  ;;  %p851_p0 = scmp.lt.s32.totalorder %s845_s21, %s1146_s7 }
  0x2f   : > { %464 = vmatpush.bf16.msra.mxu1 %v740_v3  ;;  %v735_v15 = vld [vmem:[%s1142_s3 + $0x8] sm:$0xff]  ;;  %v734_v16 = vld [vmem:[%s1142_s3] sm:$0xff]  ;;  %524 = vmatpush.bf16.msra.mxu2 %v745_v25  ;;  %p852_p1 = scmp.lt.s32.totalorder %s850_s17, %s846_s28 }
  0x30   : > { %v797_v18 = vld [vmem:[%s1141_s2] ss:$0 sm:$0xff]  ;;  %v743_v27 = vld [vmem:[%s1144_s5 + $0x8] sm:$0xff]  ;;  %p848_p9 = pnand %p847_p6, %p992_p11 }
  0x31   : > { %v742_v28 = vld [vmem:[%s1144_s5] sm:$0xff]  ;;  %p853_p3 = por %p852_p1, %p851_p0 }
  0x32   : > { %380 = vmatpush.bf16.msra.mxu0 %v731_v4  ;;  %v798_v30 = vld [vmem:[%s1143_s4] ss:$0 sm:$0xff]  ;;  %p849_p13 = pneg %p848_p9 }
  0x33   : > { %465 = vmatpush.bf16.msra.mxu1 %v739_v5  ;;  %525 = vmatpush.bf16.msra.mxu2 %v744_v26  ;;  %v799_v37 = vld [vmem:[%s1145_s6] ss:$0 sm:$0xff] }
  0x34   : > { %p854_p4 = pnand %p853_p3, %p849_p13 }
  0x36   : > { %381 = vmatpush.bf16.msra.mxu0 %v730_v6 }
  0x37   : > { %466 = vmatpush.bf16.msra.mxu1 %v738_v7  ;;  %526 = vmatpush.bf16.msra.mxu2 %v743_v27 }
  0x3a   : > { %382 = vmatpush.bf16.msra.mxu0 %v729_v8 }
  0x3b   : > { %467 = vmatpush.bf16.msra.mxu1 %v737_v13  ;;  %527 = vmatpush.bf16.msra.mxu2 %v742_v28 }
  0x3e   : > { %383 = vmatpush.bf16.msra.mxu0 %v728_v9 }
  0x3f   : > { %468 = vmatpush.bf16.msra.mxu1 %v736_v14 }
  0x42   : > { %384 = vmatpush.bf16.msra.mxu0 %v727_v10 }
  0x43   : > { %469 = vmatpush.bf16.msra.mxu1 %v735_v15 }
  0x46   : > { %385 = vmatpush.bf16.msra.mxu0 %v726_v11 }
  0x47   : > { %470 = vmatpush.bf16.msra.mxu1 %v734_v16 }
  0x49   : > { %386 = vmatmul.bf16.vlgmr.msra.gmra.mxu0 %v725_v12 }
  0xc6   : > { %v387_v17 = vpop.f32.mrf.mxu0 }
  0xc7   : > { %v388_v19 = vadd.f32 %v797_v18, %v387_v17 }
  0xc9   : > { %v392_v22 = vmax.f32 %v388_v19, 0.0 }
  0xce   : > { %v389_v20 = vpop.f32.mrf.mxu0 }
  0xcf   : > { %v390_v21 = vadd.f32 %v797_v18, %v389_v20 }
  0xd1   : > { %v393_v23 = vmax.f32 %v390_v21, 0.0 }
  0xd3   : > { %v394_v24 = vpack.c.bf16 %v393_v23, %v392_v22 }
  0xd5   : > { %471 = vmatmul.bf16.vlgmr.msra.gmra.mxu1 %v394_v24 }
 0x152   : > { %v472_v29 = vpop.f32.mrf.mxu1 }
 0x153   : > { %v473_v31 = vadd.f32 %v798_v30, %v472_v29 }
 0x155   : > { %v477_v34 = vmax.f32 %v473_v31, 0.0 }
 0x15a   : > { %v474_v32 = vpop.f32.mrf.mxu1 }
 0x15b   : > { %v475_v33 = vadd.f32 %v798_v30, %v474_v32 }
 0x15d   : > { %v478_v35 = vmax.f32 %v475_v33, 0.0 }
 0x15f   : > { %v479_v36 = vpack.c.bf16 %v478_v35, %v477_v34 }
 0x161   : > { %718 = vmatmul.msk.bf16.vlgmr.msra.gmra.mxu2 %vm516_vm0, %v479_v36 }
 0x1e4   : > { %v529_v38 = vpop.f32.mrf.mxu2 }
 0x1e5   : > { %v530_v39 = vadd.f32 %v799_v37, %v529_v38 }
 0x1e7   : > { %534 = vst [vmem:[%s298_s20] sm:$0xff] %v530_v39 }
 0x1ec   : > { %v531_v40 = vpop.f32.mrf.mxu2 }
 0x1ed   : > { %v532_v41 = vadd.f32 %v799_v37, %v531_v40 }
 0x1ef   : > { %535 = vst [vmem:[%s298_s20 + $0x8] sm:$0xff] %v532_v41 }
 0x1f0   : > { %857 = shalt.err (!%p854_p4)
}
 0x1f1   : > { %s900_s22 = smov 128   ;;  %s901_s18 = smov 8  }
 0x1f2   : > { %749 = dma.vmem_to_hbm [thread:$0]  (%p992_p11), %s550_s10, 256, %s552_s9, %s537_s29, %s900_s22, %s900_s22, %s901_s18  }
 0x1f3 PF: > { %s566_s19 = sand.u32 1, %s884_s24   ;;  %p1153_p7 = scmp.ge.s32.totalorder %s896_s27, 2 }
 0x1f4   : > { %s567_s12 = scalar_lea.sflag [#allocation4], %s566_s19 }
 0x1f5   : > { %p756_p5 = pnand %p1153_p7, %p996_p12 }
 0x1f7   : > { %p757_p8 = pneg %p756_p5 }
 0x1f9   : > { %879 = dma.done.wait (%p757_p8), %s567_s12, 256  }
 0x1fa   : > { %881 = vsyncadd (%p757_p8), %s567_s12, 4294967040  ;;  %s1154_s15 = sld [smem:[#allocation8_spill]]  ;;  %p20_p10 = scmp.ge.s32.totalorder %s967_s30, 4  }
 0x1fb   : > { %s1155_s24 = smov %s888_s25  ;;  %s1156_s25 = smov %s892_s26 }
 0x1fc   : > { %s1158_s27 = smov %s967_s30  ;;  %22 = sbr.rel (!%p20_p10) target bundleno = 5 (0x5), region = 93 }
 0x200   : > { %s1157_s26 = smov %s1154_s15 }
 0x201   :  { %573 = vsyncpa [#allocation3], 1 }
 0x202   :  { %575 = vsyncpa [#allocation3 + $0x1], 1 }
 0x203   :  { %576 = vsyncpa [#allocation4], 1 }
 0x204   :  { %578 = vsyncpa [#allocation4 + $0x1], 1 }

</bundles_post_ra>
